<compile_context>
chip_gen: v7x
topology: tpu7x:2x2x1
jax: 0.10.0
libtpu: 0.0.40
codegen_flags: <defaults>
</compile_context>

<pallas_src>
import jax
import jax.numpy as jnp
import numpy as np
from jax import lax
from jax.experimental import pallas as pl
from jax.experimental.pallas import tpu as pltpu

EPS = 1e-8  # matches nn.BatchNorm1d(..., eps=1e-08)


def _round_up(v, m):
    return (v + m - 1) // m * m


def _pad2(a, rows, cols, dtype=None):
    if dtype is not None:
        a = a.astype(dtype)
    return jnp.pad(a, ((0, rows - a.shape[0]), (0, cols - a.shape[1])))


def _make_kernel(b_real, b_pad, n_hidden, n_steps, compute_dtype):
    inv_b = 1.0 / float(b_real)
    need_mask = b_pad != b_real
    use_mxu_stats = b_pad >= 256      # column sums on the otherwise-idle MXU

    def kernel(act0_ref, w_ref, g_ref, b_ref, w_out_ref, b_out_ref,
               out_ref, skip_ref, act_ref):
        step = pl.program_id(0)       # layer-pair index

        # Batch-row masks for padded batch rows (built once per grid step).
        if use_mxu_stats:
            ones_row = (lax.broadcasted_iota(jnp.int32, (1, b_pad), 1)
                        < b_real).astype(jnp.float32)
        elif need_mask:
            row_mask = lax.broadcasted_iota(jnp.int32, (b_pad, 1), 0) < b_real

        def bn_relu(s, gamma, beta):
            # Training-mode BatchNorm1d (batch mean, biased variance) folded into
            # a single affine: scale = g * rsqrt(var + eps), shift = b - mean*scale.
            if use_mxu_stats:
                mean = jnp.dot(ones_row, s,
                               preferred_element_type=jnp.float32) * inv_b
                d = s - mean
                var = jnp.dot(ones_row, d * d,
                              preferred_element_type=jnp.float32) * inv_b
            elif need_mask:
                mean = jnp.sum(jnp.where(row_mask, s, 0.0),
                               axis=0, keepdims=True) * inv_b
                d = s - mean
                var = jnp.sum(jnp.where(row_mask, d * d, 0.0),
                              axis=0, keepdims=True) * inv_b
            else:
                mean = jnp.mean(s, axis=0, keepdims=True)
                d = s - mean
                var = jnp.mean(d * d, axis=0, keepdims=True)
            scale = gamma * lax.rsqrt(var + EPS)          # EUP rsqrt, no divide
            shift = beta - mean * scale
            return jnp.maximum(s * scale + shift, 0.0)    # fused affine + ReLU

        @pl.when(step == 0)
        def _init():
            act_ref[...] = act0_ref[...]   # input_layer output (computed by XLA)

        # First (odd) layer of the pair: hidden_layer[2*step], norm_layer[2*step].
        h = bn_relu(act_ref[...], g_ref[2 * step], b_ref[2 * step])
        h = jnp.dot(h.astype(compute_dtype), w_ref[0],
                    preferred_element_type=jnp.float32)

        # Second (even) layer of the pair feeds the skip tensor.  The last grid
        # step has no second layer (L = 2*n_steps - 1 is odd).
        @pl.when(step < n_steps - 1)
        def _even():
            h2 = bn_relu(h, g_ref[2 * step + 1], b_ref[2 * step + 1])
            h2 = jnp.dot(h2.astype(compute_dtype), w_ref[1],
                         preferred_element_type=jnp.float32)
            skip_ref[0, :, :] = h2
            act_ref[...] = h2

        # Final BN + ReLU + output_layer (with bias) at the last grid step.
        @pl.when(step == n_steps - 1)
        def _final():
            z = bn_relu(h, g_ref[n_hidden], b_ref[n_hidden])
            out_ref[...] = (jnp.dot(z.astype(compute_dtype), w_out_ref[...],
                                    preferred_element_type=jnp.float32)
                            + b_out_ref[...])

    return kernel


def deepest_net_forward(x, params, compute_dtype=jnp.bfloat16):
    """Forward pass. Returns (out (B,1) f32, skip (2**(lvl-1)-1, B, H) f32)."""
    w_in_t, w_hid_t, gamma, beta, w_out_t, b_out = params
    B, D = x.shape
    H = w_in_t.shape[1]
    L = w_hid_t.shape[0]                  # 2**lvl - 1 hidden linears
    S = (L + 1) // 2 - 1                  # 2**(lvl-1) - 1 skip slots
    P = S + 1                             # grid: S layer pairs + final lone layer
    assert S >= 1, "lvl >= 2 required (lvl == 1 has an empty skip tensor)"

    wbytes = jnp.dtype(compute_dtype).itemsize
    sublane = max(8, 32 // wbytes)        # 8 (f32), 16 (bf16), 32 (int8/fp8)
    B_pad = _round_up(B, sublane)
    H_pad = _round_up(H, 128)             # lane axis
    OUT_PAD = 128                         # lane-dense output head (sliced to 1)

    # Input layer (no bias) computed by XLA: it is used exactly once, so keeping
    # x / W_in resident in VMEM for every grid step would waste VMEM and DMAs.
    act0 = jnp.dot(x.astype(jnp.float32), w_in_t.astype(jnp.float32))
    act0_p = _pad2(act0, B_pad, H_pad)                     # (B_pad, H_pad) f32

    # Zero padding keeps padded feature columns exactly zero through BN/ReLU and
    # every matmul, so the real outputs are unchanged.  The weight stack gets one
    # extra zero layer so it blocks evenly into (2, H, H) pairs.
    w_hid_p = jnp.pad(w_hid_t.astype(compute_dtype),
                      ((0, 2 * P - L), (0, H_pad - H), (0, H_pad - H)))
    gamma_p = _pad2(gamma, L + 1, H_pad)[:, None, :]       # (L+1, 1, H_pad) f32
    beta_p = _pad2(beta, L + 1, H_pad)[:, None, :]         # (L+1, 1, H_pad) f32
    w_out_p = _pad2(w_out_t, H_pad, OUT_PAD, compute_dtype)
    b_out_p = _pad2(b_out, 1, OUT_PAD)                     # f32

    in_specs = [
        pl.BlockSpec((B_pad, H_pad), lambda g: (0, 0)),          # act0 (resident)
        pl.BlockSpec((2, H_pad, H_pad), lambda g: (g, 0, 0)),    # w_hid pair (streamed)
        pl.BlockSpec((L + 1, 1, H_pad), lambda g: (0, 0, 0)),    # gamma (resident)
        pl.BlockSpec((L + 1, 1, H_pad), lambda g: (0, 0, 0)),    # beta (resident)
        pl.BlockSpec((H_pad, OUT_PAD), lambda g: (0, 0)),        # w_out (resident)
        pl.BlockSpec((1, OUT_PAD), lambda g: (0, 0)),            # b_out (resident)
    ]
    out_specs = (
        pl.BlockSpec((B_pad, OUT_PAD), lambda g: (0, 0)),        # final output
        # One finished skip slab per pair step; the last (lone-layer) step parks
        # on slot S-1 without writing, so every HBM writeback carries final data.
        pl.BlockSpec((1, B_pad, H_pad), lambda g: (jnp.minimum(g, S - 1), 0, 0)),
    )
    out_shapes = (jax.ShapeDtypeStruct((B_pad, OUT_PAD), jnp.float32),
                  jax.ShapeDtypeStruct((S, B_pad, H_pad), jnp.float32))

    # VMEM budget: 2x every pipelined block (double buffering) + scratch + margin
    # for compiler scratch/semaphores, capped at 80% of the generation's per-core
    # VMEM (v5e/v6e: 128 MiB, v7x: 64 MiB).
    block_bytes = (B_pad * H_pad * 4                     # act0
                   + 2 * H_pad * H_pad * wbytes          # w_hid pair
                   + 2 * (L + 1) * H_pad * 4             # gamma + beta
                   + H_pad * OUT_PAD * wbytes            # w_out
                   + OUT_PAD * 4                         # b_out
                   + B_pad * OUT_PAD * 4                 # out
                   + B_pad * H_pad * 4)                  # skip slab
    vmem_need = 2 * block_bytes + B_pad * H_pad * 4 + (2 << 20)
    try:
        vmem_cap = int(pltpu.get_tpu_info().vmem_capacity_bytes)
    except Exception:
        vmem_cap = 64 << 20
    vmem_limit = int(min(max(vmem_need, 16 << 20), (vmem_cap * 4) // 5))

    kernel = _make_kernel(B, B_pad, L, P, compute_dtype)

    out_p, skip_p = pl.pallas_call(
        kernel,
        out_shape=out_shapes,
        grid=(P,),
        in_specs=in_specs,
        out_specs=out_specs,
        scratch_shapes=[pltpu.VMEM((B_pad, H_pad), jnp.float32)],  # running activation
        compiler_params=pltpu.CompilerParams(
            dimension_semantics=("arbitrary",),   # layers are sequentially dependent
            vmem_limit_bytes=vmem_limit),
    )(act0_p, w_hid_p, gamma_p, beta_p, w_out_p, b_out_p)

    return out_p[:B, :1], skip_p[:, :B, :H]


def init_params(key, dim_in, q, lvl):
    """Deterministic init mirroring the module's __init__ shapes/bounds."""
    H = dim_in * q
    L = 2 ** lvl - 1
    bound = dim_in ** (-0.5)
    k1, k2, k3, k4 = jax.random.split(key, 4)
    # torch Linear weight layout is (out, in); store the transpose for x @ W^T.
    w_in = jax.random.uniform(k1, (H, dim_in), jnp.float32, -bound, bound)
    w_hid = jax.random.uniform(k2, (L, H, H), jnp.float32, -bound, bound)
    w_out = jax.random.uniform(k3, (1, H), jnp.float32, -bound, bound)
    b_bound = H ** (-0.5)  # torch default bias init for output_layer
    b_out = jax.random.uniform(k4, (1,), jnp.float32, -b_bound, b_bound)
    gamma = jnp.ones((2 ** lvl, H), jnp.float32)   # BatchNorm affine weight
    beta = jnp.zeros((2 ** lvl, H), jnp.float32)   # BatchNorm affine bias
    return (w_in.T, jnp.transpose(w_hid, (0, 2, 1)), gamma, beta,
            w_out.T, b_out.reshape(1, 1))


def reference_forward(x, params):
    """Pure-JAX reference mirroring the PyTorch forward (training-mode BN)."""
    w_in_t, w_hid_t, gamma, beta, w_out_t, b_out = params
    L = w_hid_t.shape[0]

    def bn_relu(s, i):
        m = s.mean(0, keepdims=True)
        v = ((s - m) ** 2).mean(0, keepdims=True)
        s = (s - m) / jnp.sqrt(v + EPS) * gamma[i][None, :] + beta[i][None, :]
        return jnp.maximum(s, 0.0)

    stack = x @ w_in_t
    skips = []
    for i in range(1, L + 1):
        stack = bn_relu(stack, i - 1) @ w_hid_t[i - 1]
        if i % 2 == 0:
            skips.append(stack)
    stack = bn_relu(stack, L)
    return stack @ w_out_t + b_out, jnp.stack(skips)


if __name__ == "__main__":
    dim_in, q, lvl = 16, 2, 2     # H = 32, 3 hidden linears, 4 batchnorms, 1 skip slot
    B = 8
    key = jax.random.PRNGKey(0)
    kx, kp = jax.random.split(key)
    x = jax.random.normal(kx, (B, dim_in), dtype=jnp.float32)
    params = init_params(kp, dim_in, q, lvl)

    ref_out, ref_skips = reference_forward(x, params)

    # f32 path: exact parity with the (training-mode) PyTorch forward.
    out32, skips32 = deepest_net_forward(x, params, compute_dtype=jnp.float32)
    jax.block_until_ready((out32, skips32))
    assert out32.shape == (B, 1)
    assert skips32.shape == (2 ** (lvl - 1) - 1, B, dim_in * q)
    assert np.allclose(np.asarray(out32), np.asarray(ref_out), rtol=1e-4, atol=1e-4)
    assert np.allclose(np.asarray(skips32), np.asarray(ref_skips), rtol=1e-4, atol=1e-4)

    # Default bf16 matmul-input path (half the HBM weight stream; f32 accumulation
    # and f32 BN statistics) — checked against the f32 reference at bf16 tolerance.
    out_bf, skips_bf = deepest_net_forward(x, params)
    jax.block_until_ready((out_bf, skips_bf))
    assert out_bf.shape == (B, 1) and skips_bf.shape == skips32.shape
    assert np.isfinite(np.asarray(out_bf)).all()
    assert np.isfinite(np.asarray(skips_bf)).all()
    assert np.allclose(np.asarray(out_bf), np.asarray(ref_out), rtol=1e-1, atol=1e-1)
    assert np.allclose(np.asarray(skips_bf), np.asarray(ref_skips), rtol=1e-1, atol=1e-1)

    print("KERNEL_OK")
</pallas_src>

<mosaic_0001>
module attributes {stable_mosaic.version = 11 : i64} {
  func.func @kernel(%arg0: i32, %arg1: memref<8x128xf32, #tpu.memory_space<vmem>>, %arg2: memref<2x128x128xf32, #tpu.memory_space<vmem>>, %arg3: memref<4x1x128xf32, #tpu.memory_space<vmem>>, %arg4: memref<4x1x128xf32, #tpu.memory_space<vmem>>, %arg5: memref<128x128xf32, #tpu.memory_space<vmem>>, %arg6: memref<1x128xf32, #tpu.memory_space<vmem>>, %arg7: memref<8x128xf32, #tpu.memory_space<vmem>>, %arg8: memref<1x8x128xf32, #tpu.memory_space<vmem>>, %arg9: memref<8x128xf32, #tpu.memory_space<vmem>>) attributes {dimension_semantics = [#tpu.dimension_semantics<arbitrary>], iteration_bounds = array<i64: 2>, scalar_prefetch = 0 : i64, scratch_operands = 1 : i64, tpu.core_type = #tpu.core_type<tc>, window_params = [{pipeline_mode = #tpu.pipeline_mode<synchronous>, transform_indices = @transform_0, window_bounds = array<i64: 8, 128>}, {transform_indices = @transform_1, window_bounds = array<i64: 2, 128, 128>}, {pipeline_mode = #tpu.pipeline_mode<synchronous>, transform_indices = @transform_2, window_bounds = array<i64: 4, 1, 128>}, {pipeline_mode = #tpu.pipeline_mode<synchronous>, transform_indices = @transform_3, window_bounds = array<i64: 4, 1, 128>}, {pipeline_mode = #tpu.pipeline_mode<synchronous>, transform_indices = @transform_4, window_bounds = array<i64: 128, 128>}, {pipeline_mode = #tpu.pipeline_mode<synchronous>, transform_indices = @transform_5, window_bounds = array<i64: 1, 128>}, {pipeline_mode = #tpu.pipeline_mode<synchronous>, transform_indices = @transform_6, window_bounds = array<i64: 8, 128>}, {transform_indices = @transform_7, window_bounds = array<i64: 1, 8, 128>}]} {
    %c0_i32 = arith.constant 0 : i32
    %0 = arith.cmpi eq, %arg0, %c0_i32 : i32
    %1 = arith.extui %0 : i1 to i32
    %c0_i32_0 = arith.constant 0 : i32
    %2 = arith.cmpi ne, %1, %c0_i32_0 : i32
    scf.if %2 {
      %c0_19 = arith.constant 0 : index
      %c0_20 = arith.constant 0 : index
      %44 = vector.load %arg1[%c0_19, %c0_20] : memref<8x128xf32, #tpu.memory_space<vmem>>, vector<8x128xf32>
      %c0_21 = arith.constant 0 : index
      %c0_22 = arith.constant 0 : index
      %45 = vector.load %arg9[%c0_21, %c0_22] : memref<8x128xf32, #tpu.memory_space<vmem>>, vector<8x128xf32>
      tpu.vector_store %arg9[%c0_21, %c0_22], %44 {strides = array<i32>} : memref<8x128xf32, #tpu.memory_space<vmem>>, vector<8x128xf32>,
    } else {
    }
    %c0 = arith.constant 0 : index
    %c0_1 = arith.constant 0 : index
    %3 = vector.load %arg9[%c0, %c0_1] : memref<8x128xf32, #tpu.memory_space<vmem>>, vector<8x128xf32>
    %c2_i32 = arith.constant 2 : i32
    %4 = arith.muli %c2_i32, %arg0 : i32
    %5 = arith.index_cast %4 : i32 to index
    %c0_2 = arith.constant 0 : index
    %c0_3 = arith.constant 0 : index
    %6 = vector.load %arg3[%5, %c0_2, %c0_3] : memref<4x1x128xf32, #tpu.memory_space<vmem>>, vector<1x1x128xf32>
    %7 = vector.shape_cast %6 : vector<1x1x128xf32> to vector<1x128xf32>
    %c2_i32_4 = arith.constant 2 : i32
    %8 = arith.muli %c2_i32_4, %arg0 : i32
    %9 = arith.index_cast %8 : i32 to index
    %c0_5 = arith.constant 0 : index
    %c0_6 = arith.constant 0 : index
    %10 = vector.load %arg4[%9, %c0_5, %c0_6] : memref<4x1x128xf32, #tpu.memory_space<vmem>>, vector<1x1x128xf32>
    %11 = vector.shape_cast %10 : vector<1x1x128xf32> to vector<1x128xf32>
    %cst = arith.constant dense<0.000000e+00> : vector<128xf32>
    %12 = vector.multi_reduction <add>, %3, %cst [0] : vector<8x128xf32> to vector<128xf32>
    %13 = vector.shape_cast %12 : vector<128xf32> to vector<1x128xf32>
    %cst_7 = arith.constant 8.000000e+00 : f32
    %14 = vector.broadcast %cst_7 : f32 to vector<1x128xf32>
    %15 = arith.divf %13, %14 : vector<1x128xf32>
    %16 = vector.broadcast %15 : vector<1x128xf32> to vector<8x128xf32>
    %17 = arith.subf %3, %16 : vector<8x128xf32>
    %18 = arith.mulf %17, %17 : vector<8x128xf32>
    %cst_8 = arith.constant dense<0.000000e+00> : vector<128xf32>
    %19 = vector.multi_reduction <add>, %18, %cst_8 [0] : vector<8x128xf32> to vector<128xf32>
    %20 = vector.shape_cast %19 : vector<128xf32> to vector<1x128xf32>
    %cst_9 = arith.constant 8.000000e+00 : f32
    %21 = vector.broadcast %cst_9 : f32 to vector<1x128xf32>
    %22 = arith.divf %20, %21 : vector<1x128xf32>
    %cst_10 = arith.constant 9.99999993E-9 : f32
    %23 = vector.broadcast %cst_10 : f32 to vector<1x128xf32>
    %24 = arith.addf %22, %23 : vector<1x128xf32>
    %25 = math.rsqrt %24 : vector<1x128xf32>
    %26 = arith.mulf %7, %25 : vector<1x128xf32>
    %27 = arith.mulf %15, %26 : vector<1x128xf32>
    %28 = arith.subf %11, %27 : vector<1x128xf32>
    %29 = vector.broadcast %26 : vector<1x128xf32> to vector<8x128xf32>
    %30 = arith.mulf %3, %29 : vector<8x128xf32>
    %31 = vector.broadcast %28 : vector<1x128xf32> to vector<8x128xf32>
    %32 = arith.addf %30, %31 : vector<8x128xf32>
    %cst_11 = arith.constant 0.000000e+00 : f32
    %33 = vector.broadcast %cst_11 : f32 to vector<8x128xf32>
    %34 = arith.maximumf %32, %33 : vector<8x128xf32>
    %c0_12 = arith.constant 0 : index
    %c0_13 = arith.constant 0 : index
    %c0_14 = arith.constant 0 : index
    %35 = vector.load %arg2[%c0_12, %c0_13, %c0_14] : memref<2x128x128xf32, #tpu.memory_space<vmem>>, vector<1x128x128xf32>
    %36 = vector.shape_cast %35 : vector<1x128x128xf32> to vector<128x128xf32>
    %cst_15 = arith.constant dense<0.000000e+00> : vector<8x128xf32>
    %37 = tpu.matmul %34, %36, %cst_15 {dimension_numbers = #tpu.dot_dimension_numbers<[1], [0], [0], [1], [0, 0, 1, 1], [], []>} : vector<8x128xf32>, vector<128x128xf32>, vector<8x128xf32> -> vector<8x128xf32>
    %c1_i32 = arith.constant 1 : i32
    %38 = arith.cmpi slt, %arg0, %c1_i32 : i32
    %39 = arith.extui %38 : i1 to i32
    %c0_i32_16 = arith.constant 0 : i32
    %40 = arith.cmpi ne, %39, %c0_i32_16 : i32
    scf.if %40 {
      %c2_i32_19 = arith.constant 2 : i32
      %44 = arith.muli %c2_i32_19, %arg0 : i32
      %c1_i32_20 = arith.constant 1 : i32
      %45 = arith.addi %44, %c1_i32_20 : i32
      %46 = arith.index_cast %45 : i32 to index
      %c0_21 = arith.constant 0 : index
      %c0_22 = arith.constant 0 : index
      %47 = vector.load %arg3[%46, %c0_21, %c0_22] : memref<4x1x128xf32, #tpu.memory_space<vmem>>, vector<1x1x128xf32>
      %48 = vector.shape_cast %47 : vector<1x1x128xf32> to vector<1x128xf32>
      %c2_i32_23 = arith.constant 2 : i32
      %49 = arith.muli %c2_i32_23, %arg0 : i32
      %c1_i32_24 = arith.constant 1 : i32
      %50 = arith.addi %49, %c1_i32_24 : i32
      %51 = arith.index_cast %50 : i32 to index
      %c0_25 = arith.constant 0 : index
      %c0_26 = arith.constant 0 : index
      %52 = vector.load %arg4[%51, %c0_25, %c0_26] : memref<4x1x128xf32, #tpu.memory_space<vmem>>, vector<1x1x128xf32>
      %53 = vector.shape_cast %52 : vector<1x1x128xf32> to vector<1x128xf32>
      %cst_27 = arith.constant dense<0.000000e+00> : vector<128xf32>
      %54 = vector.multi_reduction <add>, %37, %cst_27 [0] : vector<8x128xf32> to vector<128xf32>
      %55 = vector.shape_cast %54 : vector<128xf32> to vector<1x128xf32>
      %cst_28 = arith.constant 8.000000e+00 : f32
      %56 = vector.broadcast %cst_28 : f32 to vector<1x128xf32>
      %57 = arith.divf %55, %56 : vector<1x128xf32>
      %58 = vector.broadcast %57 : vector<1x128xf32> to vector<8x128xf32>
      %59 = arith.subf %37, %58 : vector<8x128xf32>
      %60 = arith.mulf %59, %59 : vector<8x128xf32>
      %cst_29 = arith.constant dense<0.000000e+00> : vector<128xf32>
      %61 = vector.multi_reduction <add>, %60, %cst_29 [0] : vector<8x128xf32> to vector<128xf32>
      %62 = vector.shape_cast %61 : vector<128xf32> to vector<1x128xf32>
      %cst_30 = arith.constant 8.000000e+00 : f32
      %63 = vector.broadcast %cst_30 : f32 to vector<1x128xf32>
      %64 = arith.divf %62, %63 : vector<1x128xf32>
      %cst_31 = arith.constant 9.99999993E-9 : f32
      %65 = vector.broadcast %cst_31 : f32 to vector<1x128xf32>
      %66 = arith.addf %64, %65 : vector<1x128xf32>
      %67 = math.rsqrt %66 : vector<1x128xf32>
      %68 = arith.mulf %48, %67 : vector<1x128xf32>
      %69 = arith.mulf %57, %68 : vector<1x128xf32>
      %70 = arith.subf %53, %69 : vector<1x128xf32>
      %71 = vector.broadcast %68 : vector<1x128xf32> to vector<8x128xf32>
      %72 = arith.mulf %37, %71 : vector<8x128xf32>
      %73 = vector.broadcast %70 : vector<1x128xf32> to vector<8x128xf32>
      %74 = arith.addf %72, %73 : vector<8x128xf32>
      %cst_32 = arith.constant 0.000000e+00 : f32
      %75 = vector.broadcast %cst_32 : f32 to vector<8x128xf32>
      %76 = arith.maximumf %74, %75 : vector<8x128xf32>
      %c1 = arith.constant 1 : index
      %c0_33 = arith.constant 0 : index
      %c0_34 = arith.constant 0 : index
      %77 = vector.load %arg2[%c1, %c0_33, %c0_34] : memref<2x128x128xf32, #tpu.memory_space<vmem>>, vector<1x128x128xf32>
      %78 = vector.shape_cast %77 : vector<1x128x128xf32> to vector<128x128xf32>
      %cst_35 = arith.constant dense<0.000000e+00> : vector<8x128xf32>
      %79 = tpu.matmul %76, %78, %cst_35 {dimension_numbers = #tpu.dot_dimension_numbers<[1], [0], [0], [1], [0, 0, 1, 1], [], []>} : vector<8x128xf32>, vector<128x128xf32>, vector<8x128xf32> -> vector<8x128xf32>
      %c0_36 = arith.constant 0 : index
      %c0_37 = arith.constant 0 : index
      %c0_38 = arith.constant 0 : index
      %80 = vector.load %arg8[%c0_36, %c0_37, %c0_38] : memref<1x8x128xf32, #tpu.memory_space<vmem>>, vector<1x8x128xf32>
      %81 = vector.shape_cast %80 : vector<1x8x128xf32> to vector<8x128xf32>
      %82 = vector.shape_cast %79 : vector<8x128xf32> to vector<1x8x128xf32>
      tpu.vector_store %arg8[%c0_36, %c0_37, %c0_38], %82 {strides = array<i32>} : memref<1x8x128xf32, #tpu.memory_space<vmem>>, vector<1x8x128xf32>,
      %c0_39 = arith.constant 0 : index
      %c0_40 = arith.constant 0 : index
      %83 = vector.load %arg9[%c0_39, %c0_40] : memref<8x128xf32, #tpu.memory_space<vmem>>, vector<8x128xf32>
      tpu.vector_store %arg9[%c0_39, %c0_40], %79 {strides = array<i32>} : memref<8x128xf32, #tpu.memory_space<vmem>>, vector<8x128xf32>,
    } else {
    }
    %c1_i32_17 = arith.constant 1 : i32
    %41 = arith.cmpi eq, %arg0, %c1_i32_17 : i32
    %42 = arith.extui %41 : i1 to i32
    %c0_i32_18 = arith.constant 0 : i32
    %43 = arith.cmpi ne, %42, %c0_i32_18 : i32
    scf.if %43 {
      %c3 = arith.constant 3 : index
      %c0_19 = arith.constant 0 : index
      %c0_20 = arith.constant 0 : index
      %44 = vector.load %arg3[%c3, %c0_19, %c0_20] : memref<4x1x128xf32, #tpu.memory_space<vmem>>, vector<1x1x128xf32>
      %45 = vector.shape_cast %44 : vector<1x1x128xf32> to vector<1x128xf32>
      %c3_21 = arith.constant 3 : index
      %c0_22 = arith.constant 0 : index
      %c0_23 = arith.constant 0 : index
      %46 = vector.load %arg4[%c3_21, %c0_22, %c0_23] : memref<4x1x128xf32, #tpu.memory_space<vmem>>, vector<1x1x128xf32>
      %47 = vector.shape_cast %46 : vector<1x1x128xf32> to vector<1x128xf32>
      %cst_24 = arith.constant dense<0.000000e+00> : vector<128xf32>
      %48 = vector.multi_reduction <add>, %37, %cst_24 [0] : vector<8x128xf32> to vector<128xf32>
      %49 = vector.shape_cast %48 : vector<128xf32> to vector<1x128xf32>
      %cst_25 = arith.constant 8.000000e+00 : f32
      %50 = vector.broadcast %cst_25 : f32 to vector<1x128xf32>
      %51 = arith.divf %49, %50 : vector<1x128xf32>
      %52 = vector.broadcast %51 : vector<1x128xf32> to vector<8x128xf32>
      %53 = arith.subf %37, %52 : vector<8x128xf32>
      %54 = arith.mulf %53, %53 : vector<8x128xf32>
      %cst_26 = arith.constant dense<0.000000e+00> : vector<128xf32>
      %55 = vector.multi_reduction <add>, %54, %cst_26 [0] : vector<8x128xf32> to vector<128xf32>
      %56 = vector.shape_cast %55 : vector<128xf32> to vector<1x128xf32>
      %cst_27 = arith.constant 8.000000e+00 : f32
      %57 = vector.broadcast %cst_27 : f32 to vector<1x128xf32>
      %58 = arith.divf %56, %57 : vector<1x128xf32>
      %cst_28 = arith.constant 9.99999993E-9 : f32
      %59 = vector.broadcast %cst_28 : f32 to vector<1x128xf32>
      %60 = arith.addf %58, %59 : vector<1x128xf32>
      %61 = math.rsqrt %60 : vector<1x128xf32>
      %62 = arith.mulf %45, %61 : vector<1x128xf32>
      %63 = arith.mulf %51, %62 : vector<1x128xf32>
      %64 = arith.subf %47, %63 : vector<1x128xf32>
      %65 = vector.broadcast %62 : vector<1x128xf32> to vector<8x128xf32>
      %66 = arith.mulf %37, %65 : vector<8x128xf32>
      %67 = vector.broadcast %64 : vector<1x128xf32> to vector<8x128xf32>
      %68 = arith.addf %66, %67 : vector<8x128xf32>
      %cst_29 = arith.constant 0.000000e+00 : f32
      %69 = vector.broadcast %cst_29 : f32 to vector<8x128xf32>
      %70 = arith.maximumf %68, %69 : vector<8x128xf32>
      %c0_30 = arith.constant 0 : index
      %c0_31 = arith.constant 0 : index
      %71 = vector.load %arg5[%c0_30, %c0_31] : memref<128x128xf32, #tpu.memory_space<vmem>>, vector<128x128xf32>
      %cst_32 = arith.constant dense<0.000000e+00> : vector<8x128xf32>
      %72 = tpu.matmul %70, %71, %cst_32 {dimension_numbers = #tpu.dot_dimension_numbers<[1], [0], [0], [1], [0, 0, 1, 1], [], []>} : vector<8x128xf32>, vector<128x128xf32>, vector<8x128xf32> -> vector<8x128xf32>
      %c0_33 = arith.constant 0 : index
      %c0_34 = arith.constant 0 : index
      %73 = vector.load %arg6[%c0_33, %c0_34] : memref<1x128xf32, #tpu.memory_space<vmem>>, vector<1x128xf32>
      %74 = vector.broadcast %73 : vector<1x128xf32> to vector<8x128xf32>
      %75 = arith.addf %72, %74 : vector<8x128xf32>
      %c0_35 = arith.constant 0 : index
      %c0_36 = arith.constant 0 : index
      %76 = vector.load %arg7[%c0_35, %c0_36] : memref<8x128xf32, #tpu.memory_space<vmem>>, vector<8x128xf32>
      tpu.vector_store %arg7[%c0_35, %c0_36], %75 {strides = array<i32>} : memref<8x128xf32, #tpu.memory_space<vmem>>, vector<8x128xf32>,
    } else {
    }
    return
  }
  func.func @transform_0(%arg0: i32) -> (i32, i32) {
    %c0_i32 = arith.constant 0 : i32
    %c0_i32_0 = arith.constant 0 : i32
    %c0_i32_1 = arith.constant 0 : i32
    return %c0_i32, %c0_i32_0 : i32, i32
  }
  func.func @transform_1(%arg0: i32) -> (i32, i32, i32) {
    %c0_i32 = arith.constant 0 : i32
    %c0_i32_0 = arith.constant 0 : i32
    %c0_i32_1 = arith.constant 0 : i32
    return %arg0, %c0_i32, %c0_i32_0 : i32, i32, i32
  }
  func.func @transform_2(%arg0: i32) -> (i32, i32, i32) {
    %c0_i32 = arith.constant 0 : i32
    %c0_i32_0 = arith.constant 0 : i32
    %c0_i32_1 = arith.constant 0 : i32
    %c0_i32_2 = arith.constant 0 : i32
    return %c0_i32, %c0_i32_0, %c0_i32_1 : i32, i32, i32
  }
  func.func @transform_3(%arg0: i32) -> (i32, i32, i32) {
    %c0_i32 = arith.constant 0 : i32
    %c0_i32_0 = arith.constant 0 : i32
    %c0_i32_1 = arith.constant 0 : i32
    %c0_i32_2 = arith.constant 0 : i32
    return %c0_i32, %c0_i32_0, %c0_i32_1 : i32, i32, i32
  }
  func.func @transform_4(%arg0: i32) -> (i32, i32) {
    %c0_i32 = arith.constant 0 : i32
    %c0_i32_0 = arith.constant 0 : i32
    %c0_i32_1 = arith.constant 0 : i32
    return %c0_i32, %c0_i32_0 : i32, i32
  }
  func.func @transform_5(%arg0: i32) -> (i32, i32) {
    %c0_i32 = arith.constant 0 : i32
    %c0_i32_0 = arith.constant 0 : i32
    %c0_i32_1 = arith.constant 0 : i32
    return %c0_i32, %c0_i32_0 : i32, i32
  }
  func.func @transform_6(%arg0: i32) -> (i32, i32) {
    %c0_i32 = arith.constant 0 : i32
    %c0_i32_0 = arith.constant 0 : i32
    %c0_i32_1 = arith.constant 0 : i32
    return %c0_i32, %c0_i32_0 : i32, i32
  }
  func.func @transform_7(%arg0: i32) -> (i32, i32, i32) {
    %c0_i32 = arith.constant 0 : i32
    %0 = arith.minsi %arg0, %c0_i32 : i32
    %c0_i32_0 = arith.constant 0 : i32
    %c0_i32_1 = arith.constant 0 : i32
    %c0_i32_2 = arith.constant 0 : i32
    return %0, %c0_i32_0, %c0_i32_1 : i32, i32, i32
  }
}

</mosaic_0001>

<bundles_post_ra>
// kernel: tpu_custom_call.1
= control target key start
LH: loop header
LB: loop body
LE: loop exit
PB: predicated region body
PF: predicated region fallthrough
CT: control target
= control target key end

     0   :  { %s1932_s0 = inlined_call_operand.hbm [shape: f32[8,128], index: 0, kind: input, shape index: {}]   ;;  %s1933_s1 = inlined_call_operand.hbm [shape: f32[4,128,128], index: 1, kind: input, shape index: {}]   ;;  %s1934_s2 = inlined_call_operand.vmem [shape: f32[4,1,128], index: 2, kind: input, shape index: {}]   ;;  %s1935_s3 = inlined_call_operand.vmem [shape: f32[4,1,128], index: 3, kind: input, shape index: {}]   ;;  %s1936_s4 = inlined_call_operand.hbm [shape: f32[128,128], index: 4, kind: input, shape index: {}]   ;;  %s1937_s5 = inlined_call_operand.vmem [shape: f32[1,128], index: 5, kind: input, shape index: {}]   ;;  %s1938_s6 = inlined_call_operand.hbm [shape: f32[8,128], index: 6, kind: output, shape index: {0}]   ;;  %s1939_s7 = inlined_call_operand.hbm [shape: f32[1,8,128], index: 7, kind: output, shape index: {1}]  }
   0x1   :  { %1950 = sst [smem:[#allocation23_spill]] %s1939_s7 }
   0x2   :  { %13 = vsyncpa [#allocation4], 0 }
   0x3   :  { %14 = vsyncpa [#allocation7], 0 }
   0x4   :  { %16 = vsyncpa [#allocation7 + $0x1], 0 }
   0x5   :  { %17 = vsyncpa [#allocation5], 0 }
   0x6   :  { %18 = vsyncpa [#allocation11], 0 }
   0x7   :  { %20 = vsyncpa [#allocation11 + $0x1], 0  ;;  %s1543_s24 = smov 0   ;;  %s1545_s25 = smov 0  }
   0x8   :  { %s1547_s26 = smov 0   ;;  %s1549_s27 = smov 0  }
   0x9   :  { %s1551_s28 = smov 0   ;;  %s1553_s29 = smov 0  }
   0xa   :  { %s1555_s30 = smov 0  }
   0xb LB: > { %1951 = sst [smem:[#allocation17_spill]] %s1461_s24  ;;  %s1577_s8 = sadd.s32 4294967295, %s1485_s30   ;;  %s1485_s30 = sphi %s1555_s30, %s1981_s30   ;;  %s1481_s29 = sphi %s1553_s29, %s1989_s29   ;;  %s1477_s28 = sphi %s1551_s28, %s1988_s28   ;;  %s1473_s27 = sphi %s1549_s27, %s1987_s27   ;;  %s1469_s26 = sphi %s1547_s26, %s1983_s26   ;;  %s1465_s25 = sphi %s1545_s25, %s1986_s25   ;;  %s1461_s24 = sphi %s1543_s24, %s1985_s24  }
   0xc   : > { %1952 = sst [smem:[#allocation18_spill]] %s1469_s26  ;;  %s879_s9 = sadd.s32 4294967294, %s1485_s30  }
   0xd   : > { %s1581_s10 = sadd.s32 1, %s1485_s30   ;;  %s54_s11 = sadd.s32 1, %s1481_s29 }
   0xe   : > { %1953 = sst [smem:[#allocation19_spill]] %s1581_s10  ;;  %s51_s12 = ssub.s32 %s1485_s30, %s1581_s10 }
   0xf   : > { %p61_p0 = scmp.ne.s32.totalorder %s1481_s29, %s1477_s28  ;;  %p52_p1 = scmp.eq.s32.totalorder %s51_s12, 0 }
  0x10   : > { %p62_p2 = scmp.eq.s32.totalorder %s1485_s30, 0  ;;  %p67_p3 = scmp.ne.s32.totalorder %s1477_s28, %s1473_s27 }
  0x11   : > { %p1941_p4 = scmp.eq.s32.totalorder %s1577_s8, 0  ;;  %p182_p7 = scmp.lt.s32.totalorder %s1485_s30, 0 }
  0x12   : > { %s1592_s13 = scalar_select %p52_p1, %s1481_s29, %s54_s11  }
  0x13   : > { %p1594_p5 = por %p62_p2, %p61_p0  ;;  %p1600_p6 = por %p1941_p4, %p67_p3 }
  0x14   : > { %1954 = sst [smem:[#allocation20_spill]] %s1592_s13  ;;  %p184_p8 = scmp.lt.s32.totalorder %s1581_s10, 0 }
  0x15   : > { %s1956_s15 = scalar_select %p1600_p6, 1, 0 }
  0x16   : > { %s189_s16 = sadd.s32 1, %s1469_s26  ;;  %p199_p9 = scmp.ne.s32.totalorder %s1469_s26, %s1465_s25 }
  0x17   : > { %s183_s17 = scalar_select %p182_p7, %s1485_s30, 0 }
  0x18   : > { %s185_s18 = scalar_select %p184_p8, %s1581_s10, 0 }
  0x19   : > { %p1940_p10 = scmp.eq.s32.totalorder %s1577_s8, 1  ;;  %p205_p11 = scmp.ne.s32.totalorder %s1465_s25, %s1461_s24 }
  0x1a   : > { %s186_s19 = ssub.s32 %s183_s17, %s185_s18  ;;  %p206_p12 = scmp.eq.s32.totalorder %s879_s9, 1 }
  0x1b   : > { %p187_p13 = scmp.eq.s32.totalorder %s186_s19, 0  ;;  %p1616_p0 = por %p1940_p10, %p199_p9 }
  0x1c   : > { %p1620_p1 = por %p206_p12, %p205_p11  ;;  %p880_p2 = scmp.ge.s32.totalorder %s1485_s30, 1 }
  0x1d   : > { %s1957_s20 = scalar_select %p1616_p0, 1, 0 }
  0x1e   : > { %s1958_s21 = scalar_select %p1620_p1, 1, 0 }
  0x1f   : > { %s1626_s22 = scalar_select %p187_p13, %s1469_s26, %s189_s16  }
  0x20   : > { %1959 = sst [smem:[#allocation21_spill]] %s1958_s21  ;;  %p213_p3 = scmp.lt.s32.totalorder %s1485_s30, 3 }
  0x21   : > { %1960 = sst [smem:[#allocation22_spill]] %s1626_s22  ;;  %s1487_s27 = smov [#allocation8]  }
  0x22   : > { %p1630_p8 = pnand %p880_p2, %p213_p3  ;;  %s242_s9 = sshll.u32 %s1487_s27, 4  ;;  %s1634_s9 = int_to_ptr.vmem [resolvable:$true] %s242_s9 }
  0x23   : > { %p1189_p12 = scmp.lt.s32.totalorder %s1485_s30, 2  ;;  %s1488_s12 = smov [#allocation3]  }
  0x24   : > { %p1172_p9 = pneg %p1630_p8  ;;  %s226_s16 = sshll.u32 %s1488_s12, 4  ;;  %s1652_s16 = int_to_ptr.vmem [resolvable:$true] %s226_s16 }
  0x25   : > { %p1648_p13 = pnand %p1189_p12, %p1594_p5  ;;  %s1271_s27 = scalar_lea.hbm %s1936_s4, 2048 }
  0x26   : > { %p1642_p10 = pnand %p1172_p9, %p1941_p4  ;;  %p1272_p2 = scmp.ne.s32.totalorder %s1936_s4, %s1271_s27 }
  0x27   : > { %p1278_p5 = scmp.lt.u32.totalorder %s1271_s27, %s1936_s4 }
  0x28   : > { %p1273_p3 = pneg %p1642_p10 }
  0x2a   : > { %p1274_p9 = pnand %p1273_p3, %p1272_p2 }
  0x2c   : > { %p1275_p11 = pneg %p1274_p9 }
  0x2e   : > { %p1280_p12 = pnand %p1278_p5, %p1275_p11 }
  0x30   : > { %1283 = shalt.err (!%p1280_p12)
}
  0x31   : > { %s1284_s18 = scalar_lea.vmem %s1634_s9, 2048  ;;  %p1292_p0 = scmp.lt.s32.totalorder %s1634_s9, %s1634_s9 }
  0x32   : > { %p1285_p7 = scmp.ne.s32.totalorder %s1634_s9, %s1284_s18  ;;  %p1293_p2 = scmp.lt.s32.totalorder %s1284_s18, %s1284_s18 }
  0x34   : > { %p1287_p4 = pnand %p1285_p7, %p1273_p3  ;;  %p1294_p9 = por %p1293_p2, %p1292_p0 }
  0x36   : > { %p1288_p1 = pneg %p1287_p4 }
  0x38   : > { %p1295_p6 = pnand %p1294_p9, %p1288_p1 }
  0x3a   : > { %1298 = shalt.err (!%p1295_p6)
}
  0x3b   : > { %s1489_s13 = smov 128   ;;  %s1490_s22 = smov 8  }
  0x3c   : > { %1178 = dma.hbm_to_vmem [thread:$0]  (!%p1642_p10), %s1936_s4, 2048, %s1634_s9, [#allocation7], %s1489_s13, %s1489_s13, %s1490_s22  }
  0x3d   : > { %s259_s14 = sand.u32 1, %s1485_s30   ;;  %s1299_s26 = scalar_lea.hbm %s1932_s0, 128 }
  0x3e   : > { %p1300_p4 = scmp.ne.s32.totalorder %s1932_s0, %s1299_s26  ;;  %p1306_p1 = scmp.lt.u32.totalorder %s1299_s26, %s1932_s0 }
  0x40   : > { %p1302_p6 = pnand %p1300_p4, %p1273_p3 }
  0x42   : > { %p1303_p0 = pneg %p1302_p6 }
  0x44   : > { %p1308_p7 = pnand %p1306_p1, %p1303_p0 }
  0x46   : > { %1311 = shalt.err (!%p1308_p7)
}
  0x47   : > { %s1312_s9 = scalar_lea.vmem %s1652_s16, 128  ;;  %p1320_p2 = scmp.lt.s32.totalorder %s1652_s16, %s1652_s16 }
  0x48   : > { %p1313_p11 = scmp.ne.s32.totalorder %s1652_s16, %s1312_s9  ;;  %p1321_p9 = scmp.lt.s32.totalorder %s1312_s9, %s1312_s9 }
  0x4a   : > { %p1315_p5 = pnand %p1313_p11, %p1273_p3  ;;  %p1322_p4 = por %p1321_p9, %p1320_p2 }
  0x4c   : > { %p1316_p12 = pneg %p1315_p5 }
  0x4e   : > { %p1323_p6 = pnand %p1322_p4, %p1316_p12 }
  0x50   : > { %1326 = shalt.err (!%p1323_p6)
}
  0x51   : > { %1175 = dma.hbm_to_vmem [thread:$0]  (!%p1642_p10), %s1932_s0, 128, %s1652_s16, [#allocation4]  }
  0x52   : > { %s261_s26 = sand.u32 1, %s1481_s29   ;;  %s927_s10 = sshll.u32 %s1485_s30, 12 }
  0x53   : > { %s884_s21 = sshll.u32 %s261_s26, 8  ;;  %s1715_s12 = scalar_lea.hbm %s1933_s1, %s927_s10 }
  0x54   : > { %s263_s11 = scalar_lea.vmem [#allocation6], %s884_s21  ;;  %s1719_s9 = scalar_lea.sflag [#allocation7], %s259_s14 }
  0x55   : > { %s271_s18 = sshll.u32 %s263_s11, 4  ;;  %s1327_s7 = scalar_lea.hbm %s1715_s12, 4096  ;;  %s1717_s18 = int_to_ptr.vmem [resolvable:$true] %s271_s18 }
  0x56   : > { %p1328_p10 = scmp.ne.s32.totalorder %s1715_s12, %s1327_s7  ;;  %p1329_p3 = pneg %p1648_p13 }
  0x57   : > { %s1332_s26 = scalar_lea.hbm %s1933_s1, 8192  ;;  %p1333_p7 = scmp.lt.u32.totalorder %s1715_s12, %s1933_s1 }
  0x58   : > { %p1330_p0 = pnand %p1329_p3, %p1328_p10  ;;  %p1334_p11 = scmp.lt.u32.totalorder %s1332_s26, %s1327_s7 }
  0x59   : > { %p1336_p12 = scmp.lt.u32.totalorder %s1327_s7, %s1715_s12 }
  0x5a   : > { %p1331_p1 = pneg %p1330_p0  ;;  %p1335_p5 = por %p1334_p11, %p1333_p7 }
  0x5c   : > { %p1337_p2 = por %p1336_p12, %p1335_p5 }
  0x5e   : > { %p1338_p9 = pnand %p1337_p2, %p1331_p1 }
  0x60   : > { %1341 = shalt.err (!%p1338_p9)
}
  0x61   : > { %s1342_s14 = scalar_lea.vmem %s1717_s18, 4096  ;;  %s1491_s21 = smov [#allocation6]  }
  0x62   : > { %p1343_p4 = scmp.ne.s32.totalorder %s1717_s18, %s1342_s14  ;;  %s1347_s27 = sshll.u32 %s1491_s21, 4  ;;  %s1348_s27 = int_to_ptr.vmem [resolvable:$false] %s1347_s27 }
  0x63   : > { %s1349_s11 = scalar_lea.vmem %s1348_s27, 8192  ;;  %p1350_p0 = scmp.lt.s32.totalorder %s1717_s18, %s1348_s27 }
  0x64   : > { %p1345_p6 = pnand %p1343_p4, %p1329_p3  ;;  %p1351_p7 = scmp.lt.s32.totalorder %s1349_s11, %s1342_s14 }
  0x66   : > { %p1346_p10 = pneg %p1345_p6  ;;  %p1352_p11 = por %p1351_p7, %p1350_p0 }
  0x68   : > { %p1353_p5 = pnand %p1352_p11, %p1346_p10 }
  0x6a   : > { %1356 = shalt.err (!%p1353_p5)
}
  0x6b   : > { %1182 = dma.hbm_to_vmem [thread:$0]  (!%p1648_p13), %s1715_s12, 4096, %s1717_s18, %s1719_s9, %s1489_s13, %s1489_s13, %s1490_s22  }
  0x6c   : > { %283 = sbr.rel (%p1630_p8) target bundleno = 1004 (0x3ec), region = 44  ;;  %p1964_p3 = scmp.eq.s32.totalorder (!%p1630_p8), %s1577_s8, 0 }
  0x73   : > { %1440 = dma.done.wait (%p1964_p3), [#allocation4], 128   ;;  %p1965_p1 = pmov %p1964_p3 }
  0x74   : > { %s289_s17 = sand.u32 1, %s1577_s8   ;;  %s291_s7 = sand.u32 1, %s1477_s28  }
  0x75   : > { %1442 = vsyncadd (%p1965_p1), [#allocation4], 4294967168  ;;  %s890_s16 = sshll.u32 %s291_s7, 8  ;;  %s290_s24 = scalar_lea.sflag [#allocation7], %s289_s17 }
  0x76   : > { %s1758_s26 = scalar_lea.vmem [#allocation6], %s890_s16  ;;  %p1966_p12 = scmp.ne.s32.totalorder %s1956_s15, 0 }
  0x78   : > { %1444 = dma.done.wait (%p1966_p12), %s290_s24, 4096  }
  0x79   : > { %1446 = vsyncadd (%p1966_p12), %s290_s24, 4294963200  ;;  %p1967_p8 = pmov %p1965_p1 }
  0x7a   : > { %p1968_p13 = pmov %p1965_p1 }
  0x7b   : > { %1448 = dma.done.wait (%p1967_p8), [#allocation7], 2048  }
  0x7c   : > { %1450 = vsyncadd (%p1968_p13), [#allocation7], 4294965248  ;;  %s325_s23 = sand.u32 1, %s1465_s25   ;;  %p1969_p2 = scmp.ne.s32.totalorder %s1577_s8, 0 }
  0x7d   : > { %s1771_s13 = sshll.u32 %s325_s23, 3  ;;  %v335_v0 = vld [vmem:[#allocation3] sm:$0xff] (!%p1969_p2) }
  0x7e   : > { %s327_s22 = scalar_lea.vmem [#allocation10], %s1771_s13  ;;  %334 = sbr.rel (%p1969_p2) target bundleno = 133 (0x85), region = 60  ;;  %336 = vst [vmem:[#allocation2] sm:$0xff] (!%p1969_p2), %v335_v0 }
  0x85 PF: > { %v380_v1 = vld [vmem:[%s1758_s26] sm:$0xff]  ;;  %v381_v2 = vld [vmem:[%s1758_s26 + $0x8] sm:$0xff]  ;;  %v382_v3 = vld [vmem:[%s1758_s26 + $0x10] sm:$0xff]  ;;  %v1492_v4 = vmov 0.0|0.0   ;;  %vm1493_vm0 = vmmov 0   ;;  %v1494_v7 = vmov 0.0   ;;  %v366_v45 = vlaneseq }
  0x86   : > { %1084 = vmatprep.subr.bf16.mxu0 %v1492_v4  ;;  %v1085_v5 = vpack.c.bf16 %v381_v2, %v380_v1  ;;  %v383_v6 = vld [vmem:[%s1758_s26 + $0x18] sm:$0xff]  ;;  %1011 = vmatprep.mubr.msk.f32.mxu0 %vm1493_vm0, %v1494_v7  ;;  %v384_v9 = vld [vmem:[%s1758_s26 + $0x20] sm:$0xff]  ;;  %v385_v10 = vld [vmem:[%s1758_s26 + $0x28] sm:$0xff]  ;;  %s894_s15 = sshll.u32 %s1577_s8, 1  ;;  %p895_p9 = scmp.ge.s32.totalorder %s1577_s8, 1 }
  0x87   : > { %v1088_v8 = vpack.c.bf16 %v383_v6, %v382_v3  ;;  %v337_v11 = vld [vmem:[#allocation2] sm:$0xff]  ;;  %v1091_v13 = vpack.c.bf16 %v385_v10, %v384_v9  ;;  %v387_v15 = vld [vmem:[%s1758_s26 + $0x38] sm:$0xff]  ;;  %v388_v19 = vld [vmem:[%s1758_s26 + $0x40] sm:$0xff]  ;;  %s1796_s9 = scalar_lea.vmem %s1934_s2, %s894_s15  ;;  %v367_v46 = vshrl.u32 %v366_v45, 7  ;;  %s1802_s14 = scalar_lea.vmem %s1935_s3, %s894_s15  ;;  %v1495_v0 = vmov (!%p895_p9), 0.0|0.0  }
  0x88   : > { %1086 = vmatpush3.bf16.msra.mxu0 %v1085_v5  ;;  %v343_v12 = vrot.slane %v337_v11, 4  ;;  %v386_v14 = vld [vmem:[%s1758_s26 + $0x30] sm:$0xff]  ;;  %v389_v20 = vld [vmem:[%s1758_s26 + $0x48] sm:$0xff]  ;;  %v391_v25 = vld [vmem:[%s1758_s26 + $0x58] sm:$0xff]  ;;  %vm1496_vm1 = vmmov (!%p895_p9), 0   ;;  %v1497_v3 = vmov (!%p895_p9), 0.0  }
  0x89   : > { %1087 = vmatprep.subr.bf16.mxu0 %v1492_v4  ;;  %v1094_v18 = vpack.c.bf16 %v387_v15, %v386_v14  ;;  %v1097_v23 = vpack.c.bf16 %v389_v20, %v388_v19  ;;  %v390_v24 = vld [vmem:[%s1758_s26 + $0x50] sm:$0xff]  ;;  %v392_v29 = vld [vmem:[%s1758_s26 + $0x60] sm:$0xff]  ;;  %v393_v30 = vld [vmem:[%s1758_s26 + $0x68] sm:$0xff]  ;;  %v1804_v48 = vsub.s32 0, %v367_v46 }
  0x8a   : > { %v344_v16 = vadd.f32 %v343_v12, %v337_v11  ;;  %v1100_v28 = vpack.c.bf16 %v391_v25, %v390_v24  ;;  %v1103_v33 = vpack.c.bf16 %v393_v30, %v392_v29  ;;  %v394_v34 = vld [vmem:[%s1758_s26 + $0x70] sm:$0xff]  ;;  %v395_v35 = vld [vmem:[%s1758_s26 + $0x78] sm:$0xff]  ;;  %v900_v61 = vld [vmem:[%s1758_s26 + $0x80] sm:$0xff] (!%p895_p9) }
  0x8b   : > { %v1106_v38 = vpack.c.bf16 %v395_v35, %v394_v34  ;;  %v340_v47 = vld [vmem:[%s1796_s9] sm:$0x1]  ;;  %v901_v62 = vld [vmem:[%s1758_s26 + $0x88] sm:$0xff] (!%p895_p9)  ;;  %v903_v2 = vld [vmem:[%s1758_s26 + $0x98] sm:$0xff] (!%p895_p9) }
  0x8c   : > { %1089 = vmatpush3.bf16.msra.mxu0 %v1088_v8  ;;  %v345_v17 = vrot.slane %v344_v16, 2  ;;  %v342_v51 = vld [vmem:[%s1802_s14] sm:$0x1]  ;;  %v1109_v1 = vpack.c.bf16 (!%p895_p9), %v901_v62, %v900_v61  ;;  %v904_v7 = vld [vmem:[%s1758_s26 + $0xa0] sm:$0xff] (!%p895_p9)  ;;  %v905_v8 = vld [vmem:[%s1758_s26 + $0xa8] sm:$0xff] (!%p895_p9) }
  0x8d   : > { %1090 = vmatprep.subr.bf16.mxu0 %v1492_v4  ;;  %v902_v63 = vld [vmem:[%s1758_s26 + $0x90] sm:$0xff] (!%p895_p9)  ;;  %v1115_v10 = vpack.c.bf16 (!%p895_p9), %v905_v8, %v904_v7 }
  0x8e   : > { %v346_v21 = vadd.f32 %v345_v17, %v344_v16  ;;  %v1112_v5 = vpack.c.bf16 (!%p895_p9), %v903_v2, %v902_v63  ;;  %v906_v12 = vld [vmem:[%s1758_s26 + $0xb0] sm:$0xff] (!%p895_p9)  ;;  %v908_v17 = vld [vmem:[%s1758_s26 + $0xc0] sm:$0xff] (!%p895_p9) }
  0x90   : > { %1092 = vmatpush3.bf16.msra.mxu0 %v1091_v13  ;;  %v347_v22 = vrot.slane %v346_v21, 1  ;;  %v907_v13 = vld [vmem:[%s1758_s26 + $0xb8] sm:$0xff] (!%p895_p9) }
  0x91   : > { %1093 = vmatprep.subr.bf16.mxu0 %v1492_v4  ;;  %v1118_v15 = vpack.c.bf16 (!%p895_p9), %v907_v13, %v906_v12 }
  0x92   : > { %v348_v26 = vadd.f32 %v347_v22, %v346_v21  ;;  %v910_v22 = vld [vmem:[%s1758_s26 + $0xd0] sm:$0xff] (!%p895_p9) }
  0x94   : > { %1095 = vmatpush3.bf16.msra.mxu0 %v1094_v18  ;;  %v350_v27 = vmul.f32 0.125, %v348_v26  ;;  %v909_v18 = vld [vmem:[%s1758_s26 + $0xc8] sm:$0xff] (!%p895_p9) }
  0x95   : > { %1096 = vmatprep.subr.bf16.mxu0 %v1492_v4  ;;  %v1121_v20 = vpack.c.bf16 (!%p895_p9), %v909_v18, %v908_v17 }
  0x96   : > { %v351_v31 = vsub.f32 %v337_v11, %v350_v27 }
  0x98   : > { %1098 = vmatpush3.bf16.msra.mxu0 %v1097_v23  ;;  %v352_v32 = vmul.f32 %v351_v31, %v351_v31  ;;  %v911_v23 = vld [vmem:[%s1758_s26 + $0xd8] sm:$0xff] (!%p895_p9) }
  0x99   : > { %1099 = vmatprep.subr.bf16.mxu0 %v1492_v4  ;;  %v1124_v25 = vpack.c.bf16 (!%p895_p9), %v911_v23, %v910_v22 }
  0x9a   : > { %v353_v36 = vrot.slane %v352_v32, 4 }
  0x9c   : > { %1101 = vmatpush3.bf16.msra.mxu0 %v1100_v28  ;;  %v354_v37 = vadd.f32 %v353_v36, %v352_v32  ;;  %v913_v28 = vld [vmem:[%s1758_s26 + $0xe8] sm:$0xff] (!%p895_p9)  ;;  %v914_v32 = vld [vmem:[%s1758_s26 + $0xf0] sm:$0xff] (!%p895_p9) }
  0x9d   : > { %1102 = vmatprep.subr.bf16.mxu0 %v1492_v4 }
  0x9e   : > { %v355_v39 = vrot.slane %v354_v37, 2 }
  0xa0   : > { %1104 = vmatpush3.bf16.msra.mxu0 %v1103_v33  ;;  %v356_v40 = vadd.f32 %v355_v39, %v354_v37  ;;  %v915_v33 = vld [vmem:[%s1758_s26 + $0xf8] sm:$0xff] (!%p895_p9) }
  0xa1   : > { %1105 = vmatprep.subr.bf16.mxu0 %v1492_v4  ;;  %v1130_v35 = vpack.c.bf16 (!%p895_p9), %v915_v33, %v914_v32 }
  0xa2   : > { %v357_v41 = vrot.slane %v356_v40, 1 }
  0xa4   : > { %1107 = vmatpush3.bf16.msra.mxu0 %v1106_v38  ;;  %v358_v42 = vadd.f32 %v357_v41, %v356_v40  ;;  %v897_v40 = vld [vmem:[%s1796_s9 + $0x1] sm:$0x1] (!%p895_p9) }
  0xa5   : > { %1108 = vmatprep.subr.bf16.mxu0 (!%p895_p9), %v1495_v0 }
  0xa6   : > { %v359_v43 = vmul.f32 0.125, %v358_v42 }
  0xa8   : > { %v360_v44 = vadd.f32 1e-08, %v359_v43  ;;  %v899_v43 = vld [vmem:[%s1802_s14 + $0x1] sm:$0x1] (!%p895_p9) }
  0xaa   : > { %1265 = vrsqrt.f32 %v360_v44 }
  0xb4   : > { %v1266_v49 = vpop.eup %1265 }
  0xb5   : > { %v362_v50 = vmul.f32 %v1266_v49, %v340_v47 }
  0xb7   : > { %v363_v52 = vmul.f32 %v362_v50, %v350_v27  ;;  %v369_v53 = vrot.slane %v362_v50, %v1804_v48  ;;  %v912_v27 = vld [vmem:[%s1758_s26 + $0xe0] sm:$0xff] (!%p895_p9) }
  0xb8   : > { %v1127_v30 = vpack.c.bf16 (!%p895_p9), %v913_v28, %v912_v27 }
  0xb9   : > { %v364_v54 = vsub.f32 %v342_v51, %v363_v52  ;;  %v371_v55 = vmul.f32 %v369_v53, %v337_v11 }
  0xbb   : > { %v376_v56 = vrot.slane %v364_v54, %v1804_v48 }
  0xbd   : > { %v378_v57 = vadd.f32 %v376_v56, %v371_v55 }
  0xbf   : > { %v379_v58 = vmax.f32 %v378_v57, 0.0 }
  0xc1   : > { %1012 = vmatmul.mubr.f32.vlgmr.msra.gmra.mrb[0].mxu0 %v379_v58 }
  0xc2   : > { %1046 = vmatprep.mubr.msk.f32.mxu0 (!%p895_p9), %vm1496_vm1, %v1497_v3  ;;  %1110 = vmatpush3.bf16.msra.mxu0 (!%p895_p9), %v1109_v1 }
  0xc3   : > { %1111 = vmatprep.subr.bf16.mxu0 (!%p895_p9), %v1495_v0 }
  0xc6   : > { %1113 = vmatpush3.bf16.msra.mxu0 (!%p895_p9), %v1112_v5 }
  0xc7   : > { %1114 = vmatprep.subr.bf16.mxu0 (!%p895_p9), %v1495_v0 }
  0xca   : > { %1116 = vmatpush3.bf16.msra.mxu0 (!%p895_p9), %v1115_v10 }
  0xcb   : > { %1117 = vmatprep.subr.bf16.mxu0 (!%p895_p9), %v1495_v0 }
  0xce   : > { %1119 = vmatpush3.bf16.msra.mxu0 (!%p895_p9), %v1118_v15 }
  0xcf   : > { %1120 = vmatprep.subr.bf16.mxu0 (!%p895_p9), %v1495_v0 }
  0xd2   : > { %1122 = vmatpush3.bf16.msra.mxu0 (!%p895_p9), %v1121_v20 }
  0xd3   : > { %1123 = vmatprep.subr.bf16.mxu0 (!%p895_p9), %v1495_v0 }
  0xd6   : > { %1125 = vmatpush3.bf16.msra.mxu0 (!%p895_p9), %v1124_v25 }
  0xd7   : > { %1126 = vmatprep.subr.bf16.mxu0 (!%p895_p9), %v1495_v0 }
  0xda   : > { %1128 = vmatpush3.bf16.msra.mxu0 (!%p895_p9), %v1127_v30 }
  0xdb   : > { %1129 = vmatprep.subr.bf16.mxu0 (!%p895_p9), %v1495_v0 }
  0xde   : > { %1131 = vmatpush3.bf16.msra.mxu0 (!%p895_p9), %v1130_v35 }
 0x18f   : > { %469 = sbr.rel (%p895_p9) target bundleno = 675 (0x2a3), region = 64 }
 0x194   : > { %v1809_v59 = vpop.f32.mrb[0].mxu0 }
 0x195   : > { %v1013_v60 = vpop.f32.mrb[1].mxu0  ;;  %v475_v4 = vrot.slane (!%p895_p9), %v1809_v59, 4 }
 0x197   : > { %v476_v6 = vadd.f32 %v475_v4, %v1809_v59 }
 0x199   : > { %v477_v9 = vrot.slane %v476_v6, 2 }
 0x19b   : > { %v478_v11 = vadd.f32 %v477_v9, %v476_v6 }
 0x19d   : > { %v479_v14 = vrot.slane %v478_v11, 1 }
 0x19f   : > { %v480_v16 = vadd.f32 %v479_v14, %v478_v11 }
 0x1a1   : > { %v481_v19 = vmul.f32 0.125, %v480_v16 }
 0x1a3   : > { %v482_v21 = vsub.f32 %v1809_v59, %v481_v19 }
 0x1a5   : > { %v483_v24 = vmul.f32 %v482_v21, %v482_v21 }
 0x1a7   : > { %v484_v26 = vrot.slane %v483_v24, 4 }
 0x1a9   : > { %v485_v29 = vadd.f32 %v484_v26, %v483_v24 }
 0x1ab   : > { %v486_v31 = vrot.slane %v485_v29, 2 }
 0x1ad   : > { %v487_v34 = vadd.f32 %v486_v31, %v485_v29 }
 0x1af   : > { %v488_v36 = vrot.slane %v487_v34, 1 }
 0x1b1   : > { %v489_v37 = vadd.f32 %v488_v36, %v487_v34 }
 0x1b3   : > { %v490_v38 = vmul.f32 0.125, %v489_v37 }
 0x1b5   : > { %v491_v39 = vadd.f32 1e-08, %v490_v38 }
 0x1b7   : > { %1267 = vrsqrt.f32 %v491_v39 }
 0x1c1   : > { %v1268_v41 = vpop.eup %1267 }
 0x1c2   : > { %v493_v42 = vmul.f32 %v1268_v41, %v897_v40 }
 0x1c4   : > { %v494_v44 = vmul.f32 %v493_v42, %v481_v19  ;;  %v500_v45 = vrot.slane %v493_v42, %v1804_v48 }
 0x1c6   : > { %v495_v46 = vsub.f32 %v899_v43, %v494_v44  ;;  %v502_v47 = vmul.f32 %v500_v45, %v1809_v59 }
 0x1c8   : > { %v507_v49 = vrot.slane %v495_v46, %v1804_v48 }
 0x1ca   : > { %v509_v50 = vadd.f32 %v507_v49, %v502_v47 }
 0x1cc   : > { %v510_v51 = vmax.f32 %v509_v50, 0.0 }
 0x1ce   : > { %1047 = vmatmul.mubr.f32.vlgmr.msra.gmra.mrb[0].mxu0 %v510_v51 }
 0x2a1   : > { %v594_v52 = vpop.f32.mrb[0].mxu0 }
 0x2a2   : > { %598 = vst [vmem:[%s327_s22] sm:$0xff] %v594_v52  ;;  %599 = vst [vmem:[#allocation2] sm:$0xff] %v594_v52  ;;  %v1048_v53 = vpop.f32.mrb[1].mxu0 }
 0x2a3 PF: > { %p916_p4 = scmp.ne.s32.totalorder %s1577_s8, 1 }
 0x2a4   : > { %v644_v54 = vld [vmem:[#allocation8] sm:$0xff] (!%p916_p4)  ;;  %v645_v55 = vld [vmem:[#allocation8 + $0x8] sm:$0xff] (!%p916_p4)  ;;  %v646_v56 = vld [vmem:[#allocation8 + $0x10] sm:$0xff] (!%p916_p4)  ;;  %v1498_v57 = vmov (!%p916_p4), 0.0|0.0   ;;  %vm1499_vm2 = vmmov (!%p916_p4), 0   ;;  %v1500_v61 = vmov (!%p916_p4), 0.0  }
 0x2a5   : > { %603 = sbr.rel (%p916_p4) target bundleno = 949 (0x3b5), region = 68  ;;  %1132 = vmatprep.subr.bf16.mxu0 (!%p916_p4), %v1498_v57  ;;  %v1133_v58 = vpack.c.bf16 (!%p916_p4), %v645_v55, %v644_v54  ;;  %v647_v60 = vld [vmem:[#allocation8 + $0x18] sm:$0xff] (!%p916_p4)  ;;  %1081 = vmatprep.mubr.msk.f32.mxu0 (!%p916_p4), %vm1499_vm2, %v1500_v61  ;;  %v608_v62 = vrot.slane (!%p916_p4), %v1809_v59, 4  ;;  %v648_v1 = vld [vmem:[#allocation8 + $0x20] sm:$0xff] (!%p916_p4)  ;;  %v649_v2 = vld [vmem:[#allocation8 + $0x28] sm:$0xff] (!%p916_p4) }
 0x2a6   : > { %v1136_v63 = vpack.c.bf16 (!%p916_p4), %v647_v60, %v646_v56  ;;  %v1139_v4 = vpack.c.bf16 (!%p916_p4), %v649_v2, %v648_v1  ;;  %v650_v6 = vld [vmem:[#allocation8 + $0x30] sm:$0xff] (!%p916_p4)  ;;  %v651_v7 = vld [vmem:[#allocation8 + $0x38] sm:$0xff] (!%p916_p4)  ;;  %v652_v11 = vld [vmem:[#allocation8 + $0x40] sm:$0xff] (!%p916_p4) }
 0x2a7   : > { %1134 = vmatpush3.bf16.msra.mxu0 (!%p916_p4), %v1133_v58  ;;  %v609_v0 = vadd.f32 (!%p916_p4), %v608_v62, %v1809_v59  ;;  %v1142_v9 = vpack.c.bf16 (!%p916_p4), %v651_v7, %v650_v6  ;;  %v653_v12 = vld [vmem:[#allocation8 + $0x48] sm:$0xff] (!%p916_p4)  ;;  %v654_v16 = vld [vmem:[#allocation8 + $0x50] sm:$0xff] (!%p916_p4)  ;;  %v655_v17 = vld [vmem:[#allocation8 + $0x58] sm:$0xff] (!%p916_p4) }
 0x2a8   : > { %1135 = vmatprep.subr.bf16.mxu0 (!%p916_p4), %v1498_v57  ;;  %v1145_v14 = vpack.c.bf16 (!%p916_p4), %v653_v12, %v652_v11  ;;  %v1148_v19 = vpack.c.bf16 (!%p916_p4), %v655_v17, %v654_v16  ;;  %v656_v21 = vld [vmem:[#allocation8 + $0x60] sm:$0xff] (!%p916_p4)  ;;  %v657_v22 = vld [vmem:[#allocation8 + $0x68] sm:$0xff] (!%p916_p4)  ;;  %v658_v26 = vld [vmem:[#allocation8 + $0x70] sm:$0xff] (!%p916_p4) }
 0x2a9   : > { %v610_v3 = vrot.slane (!%p916_p4), %v609_v0, 2  ;;  %v1151_v24 = vpack.c.bf16 (!%p916_p4), %v657_v22, %v656_v21  ;;  %v659_v27 = vld [vmem:[#allocation8 + $0x78] sm:$0xff] (!%p916_p4)  ;;  %v917_v34 = vld [vmem:[%s1934_s2 + $0x3] sm:$0x1] (!%p916_p4)  ;;  %v919_v45 = vld [vmem:[%s1937_s5] ss:$0 sm:$0xff] (!%p916_p4) }
 0x2aa   : > { %v1154_v29 = vpack.c.bf16 (!%p916_p4), %v659_v27, %v658_v26  ;;  %v918_v37 = vld [vmem:[%s1935_s3 + $0x3] sm:$0x1] (!%p916_p4) }
 0x2ab   : > { %1137 = vmatpush3.bf16.msra.mxu0 (!%p916_p4), %v1136_v63  ;;  %v611_v5 = vadd.f32 (!%p916_p4), %v610_v3, %v609_v0 }
 0x2ac   : > { %1138 = vmatprep.subr.bf16.mxu0 %v1498_v57 }
 0x2ad   : > { %v612_v8 = vrot.slane %v611_v5, 1 }
 0x2af   : > { %1140 = vmatpush3.bf16.msra.mxu0 %v1139_v4  ;;  %v613_v10 = vadd.f32 %v612_v8, %v611_v5 }
 0x2b0   : > { %1141 = vmatprep.subr.bf16.mxu0 %v1498_v57 }
 0x2b1   : > { %v614_v13 = vmul.f32 0.125, %v613_v10 }
 0x2b3   : > { %1143 = vmatpush3.bf16.msra.mxu0 %v1142_v9  ;;  %v615_v15 = vsub.f32 %v1809_v59, %v614_v13 }
 0x2b4   : > { %1144 = vmatprep.subr.bf16.mxu0 %v1498_v57 }
 0x2b5   : > { %v616_v18 = vmul.f32 %v615_v15, %v615_v15 }
 0x2b7   : > { %1146 = vmatpush3.bf16.msra.mxu0 %v1145_v14  ;;  %v617_v20 = vrot.slane %v616_v18, 4 }
 0x2b8   : > { %1147 = vmatprep.subr.bf16.mxu0 %v1498_v57 }
 0x2b9   : > { %v618_v23 = vadd.f32 %v617_v20, %v616_v18 }
 0x2bb   : > { %1149 = vmatpush3.bf16.msra.mxu0 %v1148_v19  ;;  %v619_v25 = vrot.slane %v618_v23, 2 }
 0x2bc   : > { %1150 = vmatprep.subr.bf16.mxu0 %v1498_v57 }
 0x2bd   : > { %v620_v28 = vadd.f32 %v619_v25, %v618_v23 }
 0x2bf   : > { %1152 = vmatpush3.bf16.msra.mxu0 %v1151_v24  ;;  %v621_v30 = vrot.slane %v620_v28, 1 }
 0x2c0   : > { %1153 = vmatprep.subr.bf16.mxu0 %v1498_v57 }
 0x2c1   : > { %v622_v31 = vadd.f32 %v621_v30, %v620_v28 }
 0x2c3   : > { %1155 = vmatpush3.bf16.msra.mxu0 %v1154_v29  ;;  %v623_v32 = vmul.f32 0.125, %v622_v31 }
 0x2c5   : > { %v624_v33 = vadd.f32 1e-08, %v623_v32 }
 0x2c7   : > { %1269 = vrsqrt.f32 %v624_v33 }
 0x2d1   : > { %v1270_v35 = vpop.eup %1269 }
 0x2d2   : > { %v626_v36 = vmul.f32 %v1270_v35, %v917_v34 }
 0x2d4   : > { %v627_v38 = vmul.f32 %v626_v36, %v614_v13  ;;  %v633_v39 = vrot.slane %v626_v36, %v1804_v48 }
 0x2d6   : > { %v628_v40 = vsub.f32 %v918_v37, %v627_v38  ;;  %v635_v41 = vmul.f32 %v633_v39, %v1809_v59 }
 0x2d8   : > { %v640_v42 = vrot.slane %v628_v40, %v1804_v48 }
 0x2da   : > { %v642_v43 = vadd.f32 %v640_v42, %v635_v41 }
 0x2dc   : > { %v643_v44 = vmax.f32 %v642_v43, 0.0 }
 0x2de   : > { %1082 = vmatmul.mubr.f32.vlgmr.msra.gmra.mrb[0].mxu0 %v643_v44 }
 0x3b1   : > { %v733_v46 = vpop.f32.mrb[0].mxu0 }
 0x3b2   : > { %v734_v47 = vadd.f32 %v919_v45, %v733_v46  ;;  %v1083_v49 = vpop.f32.mrb[1].mxu0 }
 0x3b4   : > { %737 = vst [vmem:[#allocation9] sm:$0xff] %v734_v47 }
 0x3b5 PF: > { %s1501_s24 = smov [#allocation9]   ;;  %p757_p6 = scmp.lt.s32.totalorder %s1577_s8, 0 }
 0x3b6   : > { %s750_s26 = sshll.u32 %s1501_s24, 4  ;;  %s765_s15 = sshll.u32 %s327_s22, 4  ;;  %s751_s26 = int_to_ptr.vmem [resolvable:$true] %s750_s26  ;;  %s1878_s15 = int_to_ptr.vmem [resolvable:$true] %s765_s15 }
 0x3b7   : > { %s1357_s12 = scalar_lea.vmem %s751_s26, 128  ;;  %p1970_p0 = scmp.eq.s32.totalorder %s1577_s8, 1 }
 0x3b8   : > { %p1358_p10 = scmp.ne.s32.totalorder %s751_s26, %s1357_s12  ;;  %p1364_p5 = scmp.lt.s32.totalorder %s751_s26, %s751_s26 }
 0x3b9   : > { %p1365_p3 = scmp.lt.s32.totalorder %s1357_s12, %s1357_s12 }
 0x3ba   : > { %p1359_p7 = pnand %p1358_p10, %p1970_p0 }
 0x3bb   : > { %p1366_p1 = por %p1365_p3, %p1364_p5 }
 0x3bc   : > { %p1360_p11 = pneg %p1359_p7 }
 0x3be   : > { %p1367_p12 = pnand %p1366_p1, %p1360_p11 }
 0x3c0   : > { %1370 = shalt.err (!%p1367_p12)
}
 0x3c1   : > { %s1371_s10 = scalar_lea.hbm %s1938_s6, 128  ;;  %p1971_p13 = pmov %p1970_p0 }
 0x3c2   : > { %p1372_p8 = scmp.ne.s32.totalorder %s1938_s6, %s1371_s10  ;;  %p1377_p4 = scmp.lt.u32.totalorder %s1371_s10, %s1938_s6 }
 0x3c4   : > { %p1373_p2 = pnand %p1372_p8, %p1971_p13 }
 0x3c6   : > { %p1374_p9 = pneg %p1373_p2 }
 0x3c8   : > { %p1379_p10 = pnand %p1377_p4, %p1374_p9 }
 0x3ca   : > { %1382 = shalt.err (!%p1379_p10)
}
 0x3cb   : > { %1167 = dma.vmem_to_hbm [thread:$0]  (%p1970_p0), %s751_s26, 128, %s1938_s6, [#allocation5]  }
 0x3cc   : > { %s758_s11 = scalar_select %p757_p6, %s1577_s8, 0 }
 0x3cd   : > { %s1972_s24 = sld [smem:[#allocation23_spill]]  ;;  %s739_s9 = scalar_lea.sflag [#allocation11], %s325_s23 }
 0x3ce   : > { %s922_s17 = sshll.u32 %s758_s11, 7  ;;  %s1383_s10 = scalar_lea.vmem %s1878_s15, 128 }
 0x3cf   : > { %p1384_p7 = scmp.ne.s32.totalorder %s1878_s15, %s1383_s10  ;;  %p1974_p11 = scmp.ne.s32.totalorder %s1957_s20, 0 }
 0x3d0   : > { %s1502_s26 = smov [#allocation10]  }
 0x3d1   : > { %p1385_p5 = pnand %p1384_p7, %p1974_p11  ;;  %s1387_s19 = sshll.u32 %s1502_s26, 4  ;;  %s1388_s19 = int_to_ptr.vmem [resolvable:$false] %s1387_s19 }
 0x3d2   : > { %s1389_s14 = scalar_lea.vmem %s1388_s19, 256  ;;  %p1390_p6 = scmp.lt.s32.totalorder %s1878_s15, %s1388_s19 }
 0x3d3   : > { %s1973_s12 = smov %s1972_s24  ;;  %s763_s18 = scalar_lea.hbm %s1972_s24, %s922_s17 }
 0x3d4   : > { %p1386_p3 = pneg %p1385_p5  ;;  %p1391_p1 = scmp.lt.s32.totalorder %s1389_s14, %s1383_s10 }
 0x3d6   : > { %p1392_p12 = por %p1391_p1, %p1390_p6 }
 0x3d8   : > { %p1393_p8 = pnand %p1392_p12, %p1386_p3 }
 0x3da   : > { %1396 = shalt.err (!%p1393_p8)
}
 0x3db   : > { %s1397_s13 = scalar_lea.hbm %s763_s18, 128  ;;  %s1401_s21 = scalar_lea.hbm %s1973_s12, 128 }
 0x3dc   : > { %p1398_p13 = scmp.ne.s32.totalorder %s763_s18, %s1397_s13  ;;  %p1402_p4 = scmp.lt.u32.totalorder %s763_s18, %s1973_s12 }
 0x3dd   : > { %p1403_p10 = scmp.lt.u32.totalorder %s1401_s21, %s1397_s13  ;;  %p1405_p7 = scmp.lt.u32.totalorder %s1397_s13, %s763_s18 }
 0x3de   : > { %p1399_p2 = pnand %p1398_p13, %p1974_p11 }
 0x3df   : > { %p1404_p0 = por %p1403_p10, %p1402_p4 }
 0x3e0   : > { %p1400_p9 = pneg %p1399_p2 }
 0x3e1   : > { %p1406_p5 = por %p1405_p7, %p1404_p0 }
 0x3e3   : > { %p1407_p3 = pnand %p1406_p5, %p1400_p9 }
 0x3e5   : > { %1410 = shalt.err (!%p1407_p3)
}
 0x3e6   : > { %1168 = dma.vmem_to_hbm [thread:$0]  (%p1974_p11), %s1878_s15, 128, %s763_s18, %s739_s9  }
 0x3e7   : > { %p1975_p6 = scmp.eq.s32.totalorder %s1577_s8, 1 }
 0x3e9   : > { %1452 = dma.done.wait (%p1975_p6), [#allocation5], 128   ;;  %p1976_p1 = pmov %p1975_p6 }
 0x3eb   : > { %1454 = vsyncadd (%p1976_p1), [#allocation5], 4294967168 }
 0x3ec PF: > { %s1977_s17 = sld [smem:[#allocation17_spill]]  ;;  %s1978_s7 = sld [smem:[#allocation21_spill]] }
 0x3ed   : > { %p1980_p8 = scmp.ge.s32.totalorder %s1485_s30, 2 }
 0x3f2   : > { %s781_s16 = sand.u32 1, %s1977_s17   ;;  %p1979_p12 = scmp.ne.s32.totalorder %s1978_s7, 0 }
 0x3f3   : > { %s782_s24 = scalar_lea.sflag [#allocation11], %s781_s16 }
 0x3f4   : > { %p1184_p13 = pnand %p1980_p8, %p1979_p12 }
 0x3f6   : > { %1456 = dma.done.wait (!%p1184_p13), %s782_s24, 128  }
 0x3f7   : > { %1458 = vsyncadd (!%p1184_p13), %s782_s24, 4294967168  ;;  %s1981_s30 = sld [smem:[#allocation19_spill]]  ;;  %s1982_s20 = sld [smem:[#allocation18_spill]] }
 0x3f8   : > { %s1983_s26 = sld [smem:[#allocation22_spill]]  ;;  %s1984_s15 = sld [smem:[#allocation20_spill]] }
 0x3f9   : > { %s1985_s24 = smov %s1465_s25  ;;  %s1987_s27 = smov %s1477_s28 }
 0x3fa   : > { %s1988_s28 = smov %s1481_s29 }
 0x3fd   : > { %p23_p11 = scmp.ge.s32.totalorder %s1981_s30, 4   ;;  %s1986_s25 = smov %s1982_s20 }
 0x3fe   : > { %s1989_s29 = smov %s1984_s15 }
 0x3ff   :  { %25 = sbr.rel (!%p23_p11) target bundleno = 11 (0xb), region = 126 }
 0x406   :  { %787 = vsyncpa [#allocation4], 1 }
 0x407   :  { %789 = vsyncpa [#allocation4 + $0x1], 1 }
 0x408   :  { %790 = vsyncpa [#allocation7], 1 }
 0x409   :  { %792 = vsyncpa [#allocation7 + $0x1], 1 }
 0x40a   :  { %793 = vsyncpa [#allocation5], 1 }
 0x40b   :  { %795 = vsyncpa [#allocation5 + $0x1], 1 }
 0x40c   :  { %796 = vsyncpa [#allocation11], 1 }
 0x40d   :  { %798 = vsyncpa [#allocation11 + $0x1], 1 }

</bundles_post_ra>
